<compile_context>
chip_gen: v7x
topology: tpu7x:2x2x1
jax: 0.10.0
libtpu: 0.0.40
codegen_flags: <defaults>
</compile_context>

<pallas_src>
import jax
import jax.numpy as jnp
from jax.experimental import pallas as pl
from jax.experimental.pallas import tpu as pltpu


def _mlp_kernel(x_ref, w1_ref, b1_ref, w2_ref, b2_ref, out_ref):
    # h1 = relu(x @ W1 + b1)   (MXU matmul, f32 accumulate; VPU max)
    h1 = jnp.dot(x_ref[...], w1_ref[...], preferred_element_type=jnp.float32)
    h1 = jnp.maximum(h1 + b1_ref[...], 0.0)     # b1 is (1, n_hidden), broadcasts
    # out = h1 @ W2 + b2
    out_ref[...] = (
        jnp.dot(h1, w2_ref[...], preferred_element_type=jnp.float32) + b2_ref[...]
    )


def net_forward(x, w1, b1, w2, b2, *, batch_tile=512):
    """Fused forward pass of Net.

    batch <= batch_tile : single gridless call, all operands VMEM-resident.
    batch  > batch_tile : grid over batch rows; weights stay resident across
                          steps (constant index_map), batch axis is "parallel".
    """
    batch, n_input = x.shape
    n_hidden = w1.shape[1]
    n_output = w2.shape[1]

    if batch <= batch_tile:
        # Launch-overhead-dominated regime: no grid, no pipelining machinery.
        return pl.pallas_call(
            _mlp_kernel,
            out_shape=jax.ShapeDtypeStruct((batch, n_output), jnp.float32),
            in_specs=[pl.BlockSpec(memory_space=pltpu.MemorySpace.VMEM)] * 5,
            out_specs=pl.BlockSpec(memory_space=pltpu.MemorySpace.VMEM),
        )(x, w1, b1, w2, b2)

    # Batched path: tile the batch axis, pad to a multiple of the tile.
    tile = batch_tile
    padded = pl.cdiv(batch, tile) * tile
    if padded != batch:
        x = jnp.pad(x, ((0, padded - batch), (0, 0)))

    out = pl.pallas_call(
        _mlp_kernel,
        out_shape=jax.ShapeDtypeStruct((padded, n_output), jnp.float32),
        grid=(padded // tile,),
        in_specs=[
            pl.BlockSpec((tile, n_input), lambda i: (i, 0)),      # x: stream per tile
            pl.BlockSpec((n_input, n_hidden), lambda i: (0, 0)),  # weights: resident
            pl.BlockSpec((1, n_hidden), lambda i: (0, 0)),
            pl.BlockSpec((n_hidden, n_output), lambda i: (0, 0)),
            pl.BlockSpec((1, n_output), lambda i: (0, 0)),
        ],
        out_specs=pl.BlockSpec((tile, n_output), lambda i: (i, 0)),
        compiler_params=pltpu.CompilerParams(
            dimension_semantics=("parallel",)   # lets v7x shard over 2 TCs
        ),
    )(x, w1, b1, w2, b2)
    return out[:batch]


def init_params(key, n_input, n_hidden, n_output):
    """Deterministic init mimicking torch.nn.Linear default (U[-1/sqrt(fan_in), +])."""
    k1, k2, k3, k4 = jax.random.split(key, 4)
    bound1 = 1.0 / (n_input ** 0.5)
    bound2 = 1.0 / (n_hidden ** 0.5)
    # Stored as (in_features, out_features) — transpose of torch's weight layout.
    w1 = jax.random.uniform(k1, (n_input, n_hidden), jnp.float32, -bound1, bound1)
    b1 = jax.random.uniform(k2, (1, n_hidden), jnp.float32, -bound1, bound1)
    w2 = jax.random.uniform(k3, (n_hidden, n_output), jnp.float32, -bound2, bound2)
    b2 = jax.random.uniform(k4, (1, n_output), jnp.float32, -bound2, bound2)
    return w1, b1, w2, b2


if __name__ == "__main__":
    # Small shapes consistent with the module: batch=8, n_input=4, n_hidden=32, n_output=4
    batch, n_input, n_hidden, n_output = 8, 4, 32, 4

    key = jax.random.PRNGKey(0)
    kx, kp, kb = jax.random.split(key, 3)
    x = jax.random.normal(kx, (batch, n_input), dtype=jnp.float32)
    w1, b1, w2, b2 = init_params(kp, n_input, n_hidden, n_output)

    # Gridless small-batch path
    out = jax.block_until_ready(net_forward(x, w1, b1, w2, b2))
    ref = jnp.maximum(x @ w1 + b1, 0.0) @ w2 + b2
    assert out.shape == (batch, n_output)
    assert jnp.allclose(out, ref, atol=1e-5, rtol=1e-5)

    # Batch-tiled ("parallel" grid) path, including non-multiple-of-tile padding
    xb = jax.random.normal(kb, (1000, n_input), dtype=jnp.float32)
    outb = jax.block_until_ready(net_forward(xb, w1, b1, w2, b2, batch_tile=256))
    refb = jnp.maximum(xb @ w1 + b1, 0.0) @ w2 + b2
    assert outb.shape == refb.shape
    assert jnp.allclose(outb, refb, atol=1e-5, rtol=1e-5)

    print("KERNEL_OK")
</pallas_src>

<mosaic_0001>
module attributes {stable_mosaic.version = 11 : i64} {
  func.func @_mlp_kernel(%arg0: memref<8x4xf32, #tpu.memory_space<vmem>>, %arg1: memref<4x32xf32, #tpu.memory_space<vmem>>, %arg2: memref<1x32xf32, #tpu.memory_space<vmem>>, %arg3: memref<32x4xf32, #tpu.memory_space<vmem>>, %arg4: memref<1x4xf32, #tpu.memory_space<vmem>>, %arg5: memref<8x4xf32, #tpu.memory_space<vmem>>) attributes {dimension_semantics = [], scalar_prefetch = 0 : i64, scratch_operands = 0 : i64, tpu.core_type = #tpu.core_type<tc>} {
    %c0 = arith.constant 0 : index
    %c0_0 = arith.constant 0 : index
    %0 = vector.load %arg0[%c0, %c0_0] : memref<8x4xf32, #tpu.memory_space<vmem>>, vector<8x4xf32>
    %c0_1 = arith.constant 0 : index
    %c0_2 = arith.constant 0 : index
    %1 = vector.load %arg1[%c0_1, %c0_2] : memref<4x32xf32, #tpu.memory_space<vmem>>, vector<4x32xf32>
    %cst = arith.constant dense<0.000000e+00> : vector<8x32xf32>
    %2 = tpu.matmul %0, %1, %cst {dimension_numbers = #tpu.dot_dimension_numbers<[1], [0], [0], [1], [0, 0, 1, 1], [], []>} : vector<8x4xf32>, vector<4x32xf32>, vector<8x32xf32> -> vector<8x32xf32>
    %c0_3 = arith.constant 0 : index
    %c0_4 = arith.constant 0 : index
    %3 = vector.load %arg2[%c0_3, %c0_4] : memref<1x32xf32, #tpu.memory_space<vmem>>, vector<1x32xf32>
    %4 = vector.broadcast %3 : vector<1x32xf32> to vector<8x32xf32>
    %5 = arith.addf %2, %4 : vector<8x32xf32>
    %cst_5 = arith.constant 0.000000e+00 : f32
    %6 = vector.broadcast %cst_5 : f32 to vector<8x32xf32>
    %7 = arith.maximumf %5, %6 : vector<8x32xf32>
    %c0_6 = arith.constant 0 : index
    %c0_7 = arith.constant 0 : index
    %8 = vector.load %arg3[%c0_6, %c0_7] : memref<32x4xf32, #tpu.memory_space<vmem>>, vector<32x4xf32>
    %cst_8 = arith.constant dense<0.000000e+00> : vector<8x4xf32>
    %9 = tpu.matmul %7, %8, %cst_8 {dimension_numbers = #tpu.dot_dimension_numbers<[1], [0], [0], [1], [0, 0, 1, 1], [], []>} : vector<8x32xf32>, vector<32x4xf32>, vector<8x4xf32> -> vector<8x4xf32>
    %c0_9 = arith.constant 0 : index
    %c0_10 = arith.constant 0 : index
    %10 = vector.load %arg4[%c0_9, %c0_10] : memref<1x4xf32, #tpu.memory_space<vmem>>, vector<1x4xf32>
    %11 = vector.broadcast %10 : vector<1x4xf32> to vector<8x4xf32>
    %12 = arith.addf %9, %11 : vector<8x4xf32>
    %c0_11 = arith.constant 0 : index
    %c0_12 = arith.constant 0 : index
    %13 = vector.load %arg5[%c0_11, %c0_12] : memref<8x4xf32, #tpu.memory_space<vmem>>, vector<8x4xf32>
    tpu.vector_store %arg5[%c0_11, %c0_12], %12 {strides = array<i32>} : memref<8x4xf32, #tpu.memory_space<vmem>>, vector<8x4xf32>,
    return
  }
}

</mosaic_0001>

<bundles_post_ra>
// kernel: tpu_custom_call.1
= control target key start
LH: loop header
LB: loop body
LE: loop exit
PB: predicated region body
PF: predicated region fallthrough
CT: control target
= control target key end

     0   :  { %vm33_vm0 = vcmask 1043456   ;;  %vm29_vm1 = vcmask 31744   ;;  %v235_v0 = vmov 0.0   ;;  %vm236_vm2 = vmmov 0   ;;  %s297_s1 = inlined_call_operand.vmem [shape: f32[4,32], index: 1, kind: input, shape index: {}]   ;;  %s298_s0 = inlined_call_operand.vmem [shape: f32[8,4], index: 0, kind: input, shape index: {}]   ;;  %s299_s3 = inlined_call_operand.vmem [shape: f32[32,4], index: 3, kind: input, shape index: {}]   ;;  %s300_s2 = inlined_call_operand.vmem [shape: f32[1,32], index: 2, kind: input, shape index: {}]   ;;  %s301_s4 = inlined_call_operand.vmem [shape: f32[1,4], index: 4, kind: input, shape index: {}]   ;;  %s302_s5 = inlined_call_operand.vmem [shape: f32[8,4], index: 5, kind: output, shape index: {}]  }
   0x1   :  { %210 = vmatprep.subr.mxu0 %v235_v0  ;;  %v21_v1 = vld [vmem:[%s297_s1] sm:$0xf]  ;;  %212 = vmatprep.mubr.msk.f32.mxu0 %vm236_vm2, %v235_v0  ;;  %v237_v4 = vmov 0.0|0.0   ;;  %v109_v5 = vld [vmem:[%s299_s3 + $0x8] sm:$0xff]  ;;  %v110_v7 = vld [vmem:[%s299_s3 + $0x10] sm:$0xff]  ;;  %vm119_vm3 = vcmask 261120  }
   0x2   :  { %v20_v2 = vld [vmem:[%s298_s0] sm:$0xff]  ;;  %211 = vmatpush3.msk.msra.mxu0 %vm33_vm0, %v21_v1  ;;  %226 = vmatprep.subr.bf16.mxu1 %v237_v4  ;;  %v111_v8 = vld [vmem:[%s299_s3 + $0x18] sm:$0xff] }
   0x3   :  { %v108_v3 = vld [vmem:[%s299_s3] sm:$0xff]  ;;  %213 = vmatmul.mubr.msk.f32.vlgmr.msra.gmra.mrb[0].mxu0 %vm29_vm1, %v20_v2  ;;  %223 = vmatprep.mubr.msk.f32.mxu1 %vm236_vm2, %v235_v0  ;;  %v230_v9 = vpack.c.bf16 %v111_v8, %v110_v7 }
   0x4   :  { %v227_v6 = vpack.c.bf16 %v109_v5, %v108_v3  ;;  %v198_v10 = vld [vmem:[%s300_s2] ss:$0 sm:$0xff] }
   0x5   :  { %v201_v15 = vld [vmem:[%s301_s4] ss:$0 sm:$0xff] }
   0x6   :  { %228 = vmatpush3.bf16.msra.mxu1 %v227_v6 }
   0x7   :  { %229 = vmatprep.subr.bf16.mxu1 %v237_v4 }
   0xa   :  { %231 = vmatpush3.bf16.msra.mxu1 %v230_v9 }
  0xd6   :  { %v103_v11 = vpop.f32.mrb[0].mxu0 }
  0xd7   :  { %v104_v12 = vadd.f32 %v198_v10, %v103_v11  ;;  %v214_v13 = vpop.f32.mrb[1].mxu0 }
  0xd9   :  { %v107_v14 = vmax.f32 %v104_v12, 0.0 }
  0xdb   :  { %224 = vmatmul.mubr.msk.f32.vlgmr.msra.gmra.mrb[0].mxu1 %vm119_vm3, %v107_v14 }
 0x1ae   :  { %v189_v16 = vpop.f32.mrb[0].mxu1 }
 0x1af   :  { %v190_v17 = vadd.f32 %v201_v15, %v189_v16  ;;  %v225_v18 = vpop.f32.mrb[1].mxu1 }
 0x1b1   :  { %193 = vst.msk [vmem:[%s302_s5] sm:$0xff] %vm29_vm1, %v190_v17 }

</bundles_post_ra>
